<compile_context>
chip_gen: v7x
topology: tpu7x:2x2x1
jax: 0.10.0
libtpu: 0.0.40
codegen_flags: <defaults>
</compile_context>

<pallas_src>
import functools

import jax
import jax.numpy as jnp
from jax import lax
from jax.experimental import pallas as pl
from jax.experimental.pallas import tpu as pltpu


def _cdiv(a, b):
    return (a + b - 1) // b


def _round_up(x, m):
    return _cdiv(x, m) * m


# ---------------------------------------------------------------------------
# Kernels
# ---------------------------------------------------------------------------

def _whole_k_kernel(x_ref, w_ref, b_ref, o_ref, *, compute_dtype):
    """Single-step per batch tile: out = x @ W.T + b (whole K, weight resident)."""
    x = x_ref[...]
    if compute_dtype is not None:
        x = x.astype(compute_dtype)          # in-kernel cast: free VPU work
    acc = lax.dot_general(
        x, w_ref[...],
        dimension_numbers=(((1,), (1,)), ((), ())),   # x[TM,K] . W[NL,K] over K
        preferred_element_type=jnp.float32,
    )
    o_ref[...] = (acc + b_ref[...]).astype(o_ref.dtype)


def _k_tiled_kernel(x_ref, w_ref, b_ref, o_ref, acc_ref, *, compute_dtype, tk):
    """Fallback for very large K: weight whole+resident in VMEM, sliced per k step."""
    k = pl.program_id(1)

    @pl.when(k == 0)
    def _():
        # Fold bias into the accumulator init (no zeros fill + separate add).
        acc_ref[...] = jnp.broadcast_to(b_ref[...], acc_ref.shape)

    x = x_ref[...]
    if compute_dtype is not None:
        x = x.astype(compute_dtype)
    k_off = pl.multiple_of(k * tk, 128)
    w_tile = w_ref[:, pl.ds(k_off, tk)]       # VMEM slice of the resident weight
    acc_ref[...] += lax.dot_general(
        x, w_tile,
        dimension_numbers=(((1,), (1,)), ((), ())),
        preferred_element_type=jnp.float32,
    )

    @pl.when(k == pl.num_programs(1) - 1)
    def _():
        o_ref[...] = acc_ref[...].astype(o_ref.dtype)


# ---------------------------------------------------------------------------
# Wrapper
# ---------------------------------------------------------------------------

def moe_classifier_forward(x, weight, bias, *, compute_dtype=None,
                           tm_max=512, tk_max=512, force_k_tiling=False):
    """x: [B, units]; weight: [num_labels, units]; bias: [num_labels]."""
    B, units = x.shape
    num_labels, units_w = weight.shape
    assert units_w == units

    out_dtype = x.dtype
    x_itemsize = jnp.dtype(x.dtype).itemsize
    w_dtype = compute_dtype if compute_dtype is not None else weight.dtype
    w_itemsize = jnp.dtype(w_dtype).itemsize
    o_itemsize = jnp.dtype(out_dtype).itemsize

    # Lane-dense output: pad labels to exactly 128 (do NOT widen further).
    nl_pad = _round_up(max(num_labels, 128), 128)

    # Sublane alignment for the HBM dtype of x: 8 (f32) / 16 (bf16) / 32 (i8).
    sub = max(8, 32 // x_itemsize)
    b_pad_min = _round_up(B, sub)

    # VMEM budget: ~75% of physical VMEM (~48 MiB on v7x, ~96 MiB on v5e/v6e).
    try:
        info = pltpu.get_tpu_info()
        phys_vmem = int(getattr(info, "vmem_capacity_bytes", 64 * 1024 * 1024))
    except Exception:
        phys_vmem = 64 * 1024 * 1024
    budget = int(phys_vmem * 0.75)

    # Batch tiling: minimum number of tiles that respects tm_max, but at least 2 tiles
    # when the batch allows it so the "parallel" axis can shard over v7x's 2 TCs.
    n_tiles = max(_cdiv(b_pad_min, tm_max), 2 if b_pad_min >= 2 * sub else 1)
    tm = max(sub, min(tm_max, _round_up(_cdiv(b_pad_min, n_tiles), sub)))

    # ---- whole-K (common) path -------------------------------------------------
    def whole_k_bytes(tm_):
        return (2 * tm_ * units * x_itemsize        # x tiles, double-buffered
                + 2 * nl_pad * units * w_itemsize   # resident weight (conservative 2x)
                + 2 * nl_pad * 4                    # bias
                + 2 * tm_ * nl_pad * o_itemsize)    # output tiles

    if force_k_tiling:
        use_whole_k = False
    else:
        use_whole_k = whole_k_bytes(tm) <= budget
        while not use_whole_k and tm > sub:
            tm = max(sub, _round_up(tm // 2, sub))
            use_whole_k = whole_k_bytes(tm) <= budget

    bp = jnp.pad(bias.astype(jnp.float32),
                 (0, nl_pad - num_labels)).reshape(1, nl_pad)

    if use_whole_k:
        b_pad = _round_up(B, tm)
        grid_m = b_pad // tm

        # No K padding, and batch padding only when B isn't tile-aligned.
        xp = x if b_pad == B else jnp.pad(x, ((0, b_pad - B), (0, 0)))
        wp = jnp.pad(weight.astype(w_dtype),
                     ((0, nl_pad - num_labels), (0, 0)))

        vmem_limit = int(min(max(2 * whole_k_bytes(tm), 32 * 1024 * 1024), budget))

        kernel = functools.partial(_whole_k_kernel, compute_dtype=compute_dtype)
        out_padded = pl.pallas_call(
            kernel,
            out_shape=jax.ShapeDtypeStruct((b_pad, nl_pad), out_dtype),
            grid_spec=pltpu.PrefetchScalarGridSpec(
                num_scalar_prefetch=0,
                grid=(grid_m,),
                in_specs=[
                    pl.BlockSpec((tm, units), lambda i: (i, 0)),       # x, whole K
                    pl.BlockSpec((nl_pad, units), lambda i: (0, 0)),   # weight, resident
                    pl.BlockSpec((1, nl_pad), lambda i: (0, 0)),       # bias, resident
                ],
                out_specs=pl.BlockSpec((tm, nl_pad), lambda i: (i, 0)),
            ),
            compiler_params=pltpu.CompilerParams(
                dimension_semantics=("parallel",),
                vmem_limit_bytes=vmem_limit,
            ),
        )(xp, wp, bp)
        # Slice fuses with downstream consumers when called under the same jit.
        return out_padded[:B, :num_labels]

    # ---- K-tiled fallback (very large units) ------------------------------------
    k_pad = _round_up(units, 128)
    # Largest multiple-of-128 tk that divides k_pad and is <= tk_max.
    tk = 128
    for cand in range(min(_round_up(tk_max, 128), k_pad), 127, -128):
        if k_pad % cand == 0:
            tk = cand
            break

    def ktiled_bytes(tm_):
        return (2 * tm_ * tk * x_itemsize           # x tiles, double-buffered
                + 2 * nl_pad * k_pad * w_itemsize   # whole resident weight (2x safe)
                + 2 * nl_pad * 4                    # bias
                + 2 * tm_ * nl_pad * o_itemsize     # output tiles
                + tm_ * nl_pad * 4)                 # f32 accumulator scratch

    while ktiled_bytes(tm) > budget and tm > sub:
        tm = max(sub, _round_up(tm // 2, sub))

    b_pad = _round_up(B, tm)
    grid = (b_pad // tm, k_pad // tk)

    xp = x
    if b_pad != B or k_pad != units:
        xp = jnp.pad(x, ((0, b_pad - B), (0, k_pad - units)))
    wp = jnp.pad(weight.astype(w_dtype),
                 ((0, nl_pad - num_labels), (0, k_pad - units)))

    vmem_limit = int(min(max(2 * ktiled_bytes(tm), 32 * 1024 * 1024), budget))

    kernel = functools.partial(_k_tiled_kernel, compute_dtype=compute_dtype, tk=tk)
    out_padded = pl.pallas_call(
        kernel,
        out_shape=jax.ShapeDtypeStruct((b_pad, nl_pad), out_dtype),
        grid_spec=pltpu.PrefetchScalarGridSpec(
            num_scalar_prefetch=0,
            grid=grid,
            in_specs=[
                pl.BlockSpec((tm, tk), lambda i, k: (i, k)),            # x tile
                pl.BlockSpec((nl_pad, k_pad), lambda i, k: (0, 0)),     # weight, resident
                pl.BlockSpec((1, nl_pad), lambda i, k: (0, 0)),         # bias, resident
            ],
            out_specs=pl.BlockSpec((tm, nl_pad), lambda i, k: (i, 0)),
            scratch_shapes=[pltpu.VMEM((tm, nl_pad), jnp.float32)],
        ),
        compiler_params=pltpu.CompilerParams(
            dimension_semantics=("parallel", "arbitrary"),
            vmem_limit_bytes=vmem_limit,
        ),
    )(xp, wp, bp)
    return out_padded[:B, :num_labels]


# ---------------------------------------------------------------------------
# Self-test
# ---------------------------------------------------------------------------

if __name__ == "__main__":
    key = jax.random.PRNGKey(0)
    k1, k2, k3 = jax.random.split(key, 3)

    # Case 1: small module-consistent shapes: batch=8, units=32, num_labels=2.
    batch, units, num_labels = 8, 32, 2
    x = jax.random.normal(k1, (batch, units), dtype=jnp.float32)
    # init_bert_weights: W ~ N(0, 0.02), b = 0.
    weight = 0.02 * jax.random.normal(k2, (num_labels, units), dtype=jnp.float32)
    bias = jnp.zeros((num_labels,), dtype=jnp.float32)
    ref = x @ weight.T + bias

    out = jax.block_until_ready(moe_classifier_forward(x, weight, bias))
    assert out.shape == (batch, num_labels)
    assert jnp.allclose(out, ref, atol=1e-5, rtol=1e-5)

    # bf16 MXU-input path (x cast in-kernel, weight cast in wrapper, f32 accumulation).
    out_bf16 = jax.block_until_ready(
        moe_classifier_forward(x, weight, bias, compute_dtype=jnp.bfloat16))
    assert out_bf16.shape == (batch, num_labels)
    assert jnp.allclose(out_bf16, ref, atol=2e-2, rtol=2e-2)

    # Case 2: multiple batch tiles (exercises the "parallel"/megacore grid axis).
    batch2, units2 = 64, 256
    x2 = jax.random.normal(k3, (batch2, units2), dtype=jnp.float32)
    w2 = 0.02 * jax.random.normal(k2, (num_labels, units2), dtype=jnp.float32)
    b2 = jnp.zeros((num_labels,), dtype=jnp.float32)
    ref2 = x2 @ w2.T + b2
    out2 = jax.block_until_ready(moe_classifier_forward(x2, w2, b2))
    assert out2.shape == (batch2, num_labels)
    assert jnp.allclose(out2, ref2, atol=1e-4, rtol=1e-4)

    # Case 3: force the K-tiled fallback (resident weight + bias-initialized accumulator).
    out3 = jax.block_until_ready(
        moe_classifier_forward(x2, w2, b2, force_k_tiling=True, tk_max=128))
    assert out3.shape == (batch2, num_labels)
    assert jnp.allclose(out3, ref2, atol=1e-4, rtol=1e-4)

    print("KERNEL_OK")
</pallas_src>

<mosaic_0001>
module attributes {stable_mosaic.version = 11 : i64} {
  func.func @_whole_k_kernel(%arg0: i32, %arg1: memref<8x32xf32, #tpu.memory_space<vmem>>, %arg2: memref<128x32xf32, #tpu.memory_space<vmem>>, %arg3: memref<1x128xf32, #tpu.memory_space<vmem>>, %arg4: memref<8x128xf32, #tpu.memory_space<vmem>>) attributes {dimension_semantics = [#tpu.dimension_semantics<parallel>], iteration_bounds = array<i64: 1>, scalar_prefetch = 0 : i64, scratch_operands = 0 : i64, tpu.core_type = #tpu.core_type<tc>, window_params = [{transform_indices = @transform_0, window_bounds = array<i64: 8, 32>}, {pipeline_mode = #tpu.pipeline_mode<synchronous>, transform_indices = @transform_1, window_bounds = array<i64: 128, 32>}, {pipeline_mode = #tpu.pipeline_mode<synchronous>, transform_indices = @transform_2, window_bounds = array<i64: 1, 128>}, {transform_indices = @transform_3, window_bounds = array<i64: 8, 128>}]} {
    %c0 = arith.constant 0 : index
    %c0_0 = arith.constant 0 : index
    %0 = vector.load %arg1[%c0, %c0_0] : memref<8x32xf32, #tpu.memory_space<vmem>>, vector<8x32xf32>
    %c0_1 = arith.constant 0 : index
    %c0_2 = arith.constant 0 : index
    %1 = vector.load %arg2[%c0_1, %c0_2] : memref<128x32xf32, #tpu.memory_space<vmem>>, vector<128x32xf32>
    %cst = arith.constant dense<0.000000e+00> : vector<8x128xf32>
    %2 = tpu.matmul %0, %1, %cst {dimension_numbers = #tpu.dot_dimension_numbers<[1], [1], [0], [0], [0, 0, 1, 0], [], []>} : vector<8x32xf32>, vector<128x32xf32>, vector<8x128xf32> -> vector<8x128xf32>
    %c0_3 = arith.constant 0 : index
    %c0_4 = arith.constant 0 : index
    %3 = vector.load %arg3[%c0_3, %c0_4] : memref<1x128xf32, #tpu.memory_space<vmem>>, vector<1x128xf32>
    %4 = vector.broadcast %3 : vector<1x128xf32> to vector<8x128xf32>
    %5 = arith.addf %2, %4 : vector<8x128xf32>
    %c0_5 = arith.constant 0 : index
    %c0_6 = arith.constant 0 : index
    %6 = vector.load %arg4[%c0_5, %c0_6] : memref<8x128xf32, #tpu.memory_space<vmem>>, vector<8x128xf32>
    tpu.vector_store %arg4[%c0_5, %c0_6], %5 {strides = array<i32>} : memref<8x128xf32, #tpu.memory_space<vmem>>, vector<8x128xf32>,
    return
  }
  func.func @transform_0(%arg0: i32) -> (i32, i32) {
    %c0_i32 = arith.constant 0 : i32
    %c0_i32_0 = arith.constant 0 : i32
    return %arg0, %c0_i32 : i32, i32
  }
  func.func @transform_1(%arg0: i32) -> (i32, i32) {
    %c0_i32 = arith.constant 0 : i32
    %c0_i32_0 = arith.constant 0 : i32
    %c0_i32_1 = arith.constant 0 : i32
    return %c0_i32, %c0_i32_0 : i32, i32
  }
  func.func @transform_2(%arg0: i32) -> (i32, i32) {
    %c0_i32 = arith.constant 0 : i32
    %c0_i32_0 = arith.constant 0 : i32
    %c0_i32_1 = arith.constant 0 : i32
    return %c0_i32, %c0_i32_0 : i32, i32
  }
  func.func @transform_3(%arg0: i32) -> (i32, i32) {
    %c0_i32 = arith.constant 0 : i32
    %c0_i32_0 = arith.constant 0 : i32
    return %arg0, %c0_i32 : i32, i32
  }
}

</mosaic_0001>

<bundles_post_ra>
// kernel: tpu_custom_call.1
= control target key start
LH: loop header
LB: loop body
LE: loop exit
PB: predicated region body
PF: predicated region fallthrough
CT: control target
= control target key end

     0   :  { %vm39_vm0 = vcmask 261120   ;;  %v306_v2 = vmov 0.0|0.0   ;;  %vm307_vm2 = vmmov 0   ;;  %v308_v5 = vmov 0.0   ;;  %s419_s0 = inlined_call_operand.vmem [shape: f32[8,32], index: 0, kind: input, shape index: {}]   ;;  %s420_s1 = inlined_call_operand.vmem [shape: f32[128,32], index: 1, kind: input, shape index: {}]   ;;  %s421_s2 = inlined_call_operand.vmem [shape: f32[1,128], index: 2, kind: input, shape index: {}]   ;;  %s422_s3 = inlined_call_operand.hbm [shape: f32[8,128], index: 3, kind: output, shape index: {}]  }
   0x1   :  { %v16_v0 = vld [vmem:[%s420_s1] sm:$0xff]  ;;  %v17_v1 = vld [vmem:[%s420_s1 + $0x8] sm:$0xff]  ;;  %246 = vmatprep.subr.bf16.mxu0 %v306_v2  ;;  %vm338_vm1 = vmpackc.low %vm39_vm0, %vm39_vm0  ;;  %243 = vmatprep.mubr.msk.f32.mxu0 %vm307_vm2, %v308_v5 }
   0x2   :  { %v247_v3 = vpack.c.bf16 %v17_v1, %v16_v0  ;;  %v18_v6 = vld [vmem:[%s420_s1 + $0x10] sm:$0xff]  ;;  %v19_v7 = vld [vmem:[%s420_s1 + $0x18] sm:$0xff] }
   0x4   :  { %249 = vmatpush3.bf16.xpose.msk.msra.mxu0 %vm338_vm1, %v247_v3 }
   0x5   :  { %250 = vmatprep.subr.bf16.mxu0 %v306_v2 }
   0x6   :  { %8 = vsyncpa [#allocation3], 0  ;;  %v251_v8 = vpack.c.bf16 %v19_v7, %v18_v6  ;;  %v20_v9 = vld [vmem:[%s420_s1 + $0x20] sm:$0xff]  ;;  %v21_v10 = vld [vmem:[%s420_s1 + $0x28] sm:$0xff]  ;;  %s309_s21 = smov [#allocation2]  }
   0x7   :  { %v255_v11 = vpack.c.bf16 %v21_v10, %v20_v9  ;;  %v22_v12 = vld [vmem:[%s420_s1 + $0x30] sm:$0xff]  ;;  %v23_v13 = vld [vmem:[%s420_s1 + $0x38] sm:$0xff]  ;;  %v24_v15 = vld [vmem:[%s420_s1 + $0x40] sm:$0xff]  ;;  %s168_s22 = sshll.u32 %s309_s21, 4  ;;  %s169_s22 = int_to_ptr.vmem [resolvable:$true] %s168_s22 }
   0x8   :  { %v259_v14 = vpack.c.bf16 %v23_v13, %v22_v12  ;;  %v25_v16 = vld [vmem:[%s420_s1 + $0x48] sm:$0xff]  ;;  %v26_v18 = vld [vmem:[%s420_s1 + $0x50] sm:$0xff]  ;;  %v27_v19 = vld [vmem:[%s420_s1 + $0x58] sm:$0xff]  ;;  %p287_p1 = scmp.lt.s32.totalorder %s169_s22, %s169_s22 }
   0x9   :  { %v263_v17 = vpack.c.bf16 %v25_v16, %v24_v15  ;;  %v267_v20 = vpack.c.bf16 %v27_v19, %v26_v18  ;;  %v28_v21 = vld [vmem:[%s420_s1 + $0x60] sm:$0xff]  ;;  %v29_v22 = vld [vmem:[%s420_s1 + $0x68] sm:$0xff]  ;;  %v30_v24 = vld [vmem:[%s420_s1 + $0x70] sm:$0xff] }
   0xa   :  { %v271_v23 = vpack.c.bf16 %v29_v22, %v28_v21  ;;  %v31_v25 = vld [vmem:[%s420_s1 + $0x78] sm:$0xff]  ;;  %v15_v27 = vld [vmem:[%s419_s0] sm:$0xff]  ;;  %s282_s1 = scalar_lea.vmem %s169_s22, 128 }
   0xb   :  { %v275_v26 = vpack.c.bf16 %v31_v25, %v30_v24  ;;  %v176_v28 = vld [vmem:[%s421_s2] ss:$0 sm:$0xff]  ;;  %p283_p0 = scmp.ne.s32.totalorder %s169_s22, %s282_s1  ;;  %p288_p2 = scmp.lt.s32.totalorder %s282_s1, %s282_s1 }
   0xc   :  { %253 = vmatpush3.bf16.xpose.msk.msra.mxu0 %vm338_vm1, %v251_v8 }
   0xd   :  { %254 = vmatprep.subr.bf16.mxu0 %v306_v2  ;;  %p289_p3 = por %p288_p2, %p287_p1 }
   0xf   :  { %p290_p4 = pnand %p289_p3, %p283_p0 }
  0x14   :  { %257 = vmatpush3.bf16.xpose.msk.msra.mxu0 %vm338_vm1, %v255_v11 }
  0x15   :  { %258 = vmatprep.subr.bf16.mxu0 %v306_v2 }
  0x1c   :  { %261 = vmatpush3.bf16.xpose.msk.msra.mxu0 %vm338_vm1, %v259_v14 }
  0x1d   :  { %262 = vmatprep.subr.bf16.mxu0 %v306_v2 }
  0x24   :  { %265 = vmatpush3.bf16.xpose.msk.msra.mxu0 %vm338_vm1, %v263_v17 }
  0x25   :  { %266 = vmatprep.subr.bf16.mxu0 %v306_v2 }
  0x2c   :  { %269 = vmatpush3.bf16.xpose.msk.msra.mxu0 %vm338_vm1, %v267_v20 }
  0x2d   :  { %270 = vmatprep.subr.bf16.mxu0 %v306_v2 }
  0x34   :  { %273 = vmatpush3.bf16.xpose.msk.msra.mxu0 %vm338_vm1, %v271_v23 }
  0x35   :  { %274 = vmatprep.subr.bf16.mxu0 %v306_v2 }
  0x3c   :  { %277 = vmatpush3.bf16.xpose.msk.msra.mxu0 %vm338_vm1, %v275_v26 }
  0x43   :  { %244 = vmatmul.mubr.msk.f32.vlgmr.msra.gmra.mrb[0].mxu0 %vm39_vm0, %v15_v27 }
 0x116   :  { %v157_v29 = vpop.f32.mrb[0].mxu0 }
 0x117   :  { %v158_v30 = vadd.f32 %v176_v28, %v157_v29  ;;  %v245_v31 = vpop.f32.mrb[1].mxu0 }
 0x119   :  { %161 = vst [vmem:[#allocation2] sm:$0xff] %v158_v30 }
 0x11a   :  { %293 = shalt.err (!%p290_p4)
}
 0x11b   :  { %s294_s24 = scalar_lea.hbm %s422_s3, 128 }
 0x11c   :  { %p295_p5 = scmp.ne.s32.totalorder %s422_s3, %s294_s24  ;;  %p298_p6 = scmp.lt.u32.totalorder %s294_s24, %s422_s3 }
 0x11e   :  { %p300_p7 = pnand %p298_p6, %p295_p5 }
 0x120   :  { %303 = shalt.err (!%p300_p7)
}
 0x121   :  { %171 = dma.vmem_to_hbm [thread:$0]  %s169_s22, 128, %s422_s3, [#allocation3]  }
 0x122   :  { %304 = dma.done.wait [#allocation3], 128  }
 0x123   :  { %305 = vsyncadd [#allocation3], 4294967168 }
 0x124   :  { %175 = vsyncpa [#allocation3], 1 }

</bundles_post_ra>
